<compile_context>
chip_gen: v7x
topology: tpu7x:2x2x1
jax: 0.10.0
libtpu: 0.0.40
codegen_flags: <defaults>
</compile_context>

<pallas_src>
import functools
import math

import jax
import jax.numpy as jnp
from jax import lax
from jax.experimental import pallas as pl
from jax.experimental.pallas import tpu as pltpu


def _round_up(x, m):
    return (x + m - 1) // m * m


def _pick_hidden_chunk(hp, target=1024):
    """Largest multiple of 128 that divides hp and is <= target (hp % 128 == 0)."""
    n = hp // 128
    best = 1
    for d in range(1, n + 1):
        if n % d == 0 and d * 128 <= target:
            best = d
    return best * 128


def _vmem_limit_bytes():
    cap = 64 * 1024 * 1024                     # conservative default (v7x-sized)
    try:
        info = pltpu.get_tpu_info()
        cap = int(getattr(info, "vmem_capacity_bytes", cap))
    except Exception:
        pass
    # ~20% headroom for compiler-internal scratch (v6e: ~102 MiB, v7x: ~51 MiB)
    return max(32 * 1024 * 1024, (cap * 4) // 5)


def _ffn_kernel(body_ref, halo_ref, wc_ref, bc_ref, w2_ref, b2_ref, o_ref,
                *, seq_tile, ksize, n_chunks):
    # body_ref: (1, TL, Dp)       bf16  current sequence tile
    # halo_ref: (1, 1, HALO, Dp)  bf16  next 2*pad rows (conv right-halo)
    # wc_ref  : (NH, k*Dp, CH)    bf16  fused conv weight (tap-major rows), hidden-chunked
    # bc_ref  : (NH, 1, CH)       f32   conv bias
    # w2_ref  : (NH, CH, Dp)      bf16  linear weight (transposed), hidden-chunked
    # b2_ref  : (1, Dp)           f32   linear bias
    # o_ref   : (1, TL, Dp)
    body = body_ref[0]                                       # (TL, Dp)
    if ksize > 1:
        halo = halo_ref[0, 0]                                # (2*pad, Dp)
        xw = jnp.concatenate([body, halo], axis=0)           # (TL + 2*pad, Dp)
        # im2col slab built at value level (no VMEM scratch roundtrip).
        lhs = jnp.concatenate([xw[t:t + seq_tile, :] for t in range(ksize)], axis=1)
    else:
        lhs = body                                           # k == 1: pointwise conv

    inv_sqrt2 = 0.7071067811865476
    acc = None
    for c in range(n_chunks):                                # static unroll; NH is small
        h = jnp.dot(lhs, wc_ref[c], preferred_element_type=jnp.float32)
        h = h + bc_ref[c]
        # exact (erf-based) GELU in f32, matching torch.nn.GELU() default
        h = 0.5 * h * (1.0 + lax.erf(h * inv_sqrt2))
        part = jnp.dot(h.astype(w2_ref.dtype), w2_ref[c],
                       preferred_element_type=jnp.float32)
        acc = part if acc is None else acc + part
    o_ref[0] = (acc + b2_ref[...]).astype(o_ref.dtype)


def ffn_pallas(x, conv_w, conv_b, lin_w, lin_b, kernel_size, *,
               seq_tile=None, hidden_chunk=1024, compute_dtype=jnp.bfloat16):
    """x: (B, L, dim). conv_w: (hidden, dim, k). lin_w: (dim, hidden)."""
    B, L, dim = x.shape
    hidden = conv_w.shape[0]
    k = int(kernel_size)
    # Even k with padding=k//2 makes PyTorch Conv1d emit L+1 positions; unsupported.
    assert k % 2 == 1, "ffn_pallas requires an odd kernel_size"
    pad = k // 2
    halo_rows = max(2 * pad, 1)

    Dp = _round_up(dim, 128)                   # lane-dense channels
    Hp = _round_up(hidden, 128)                # lane-dense hidden
    CH = _pick_hidden_chunk(Hp, hidden_chunk)  # in-kernel hidden chunk
    NH = Hp // CH

    w_isz = jnp.dtype(compute_dtype).itemsize
    out_isz = jnp.dtype(x.dtype).itemsize
    vmem_limit = _vmem_limit_bytes()

    # --- sequence-tile selection (generation aware) ---
    if seq_tile is None:
        weight_bytes = (k * Dp * Hp + Hp * Dp) * w_isz + (Hp + Dp) * 4
        budget = vmem_limit - weight_bytes - (8 << 20)   # margin for compiler scratch
        # per-seq-row bytes: body(x2 bufs) + out(x2) + im2col slab + h chunk + acc + window
        per_row = (2 * 2 + 2 * out_isz + 2 * k + 2 + 4) * Dp + 4 * CH
        tl = (budget // per_row) if budget > 0 else 8
        tl = min(512, int(tl))
        if tl >= 256:
            tl = (tl // 256) * 256
        elif tl >= 128:
            tl = 128
    else:
        tl = int(seq_tile)
    tl = min(tl, _round_up(L, 8))
    TL = max(8, (tl // 8) * 8)

    Lr = _round_up(L, TL)
    NL = Lr // TL
    Lp_total = Lr + 2 * pad

    # --- host-side prep (one padded copy of x; halo tails are a tiny gather) ---
    xc = x.astype(compute_dtype)
    x_pad = jnp.pad(xc, ((0, 0), (pad, pad + (Lr - L)), (0, Dp - dim)))  # (B, Lp_total, Dp)
    halo_idx = (jnp.arange(NL) + 1)[:, None] * TL + jnp.arange(halo_rows)[None, :]
    halo_idx = jnp.minimum(halo_idx, Lp_total - 1)
    x_halo = jnp.take(x_pad, halo_idx, axis=1)               # (B, NL, halo_rows, Dp)

    # conv weight -> (NH, k*Dp, CH); row index = tap*Dp + in_channel
    wc = jnp.transpose(conv_w, (2, 1, 0))                    # (k, dim, hidden)
    wc = jnp.pad(wc, ((0, 0), (0, Dp - dim), (0, Hp - hidden)))
    wc = wc.reshape(k * Dp, NH, CH).transpose(1, 0, 2).astype(compute_dtype)
    bc = jnp.pad(conv_b, (0, Hp - hidden)).astype(jnp.float32).reshape(NH, 1, CH)
    w2 = jnp.pad(lin_w.T, ((0, Hp - hidden), (0, Dp - dim)))
    w2 = w2.reshape(NH, CH, Dp).astype(compute_dtype)        # (NH, CH, Dp)
    b2 = jnp.pad(lin_b, (0, Dp - dim)).astype(jnp.float32).reshape(1, Dp)

    kernel = functools.partial(_ffn_kernel, seq_tile=TL, ksize=k, n_chunks=NH)

    def _call(single_buffer_weights):
        def const_spec(shape):
            idx = (lambda b, l: (0, 0, 0)) if len(shape) == 3 else (lambda b, l: (0, 0))
            if single_buffer_weights:
                # grid-invariant block: one VMEM buffer is enough
                return pl.BlockSpec(shape, idx, pipeline_mode=pl.Buffered(1))
            return pl.BlockSpec(shape, idx)

        grid_spec = pltpu.PrefetchScalarGridSpec(
            num_scalar_prefetch=0,
            grid=(B, NL),
            in_specs=[
                pl.BlockSpec((1, TL, Dp), lambda b, l: (b, l, 0)),
                pl.BlockSpec((1, 1, halo_rows, Dp), lambda b, l: (b, l, 0, 0)),
                const_spec((NH, k * Dp, CH)),
                const_spec((NH, 1, CH)),
                const_spec((NH, CH, Dp)),
                const_spec((1, Dp)),
            ],
            out_specs=pl.BlockSpec((1, TL, Dp), lambda b, l: (b, l, 0)),
        )
        return pl.pallas_call(
            kernel,
            out_shape=jax.ShapeDtypeStruct((B, Lr, Dp), x.dtype),
            grid_spec=grid_spec,
            compiler_params=pltpu.CompilerParams(
                dimension_semantics=("parallel", "parallel"),
                vmem_limit_bytes=int(vmem_limit),
            ),
        )(x_pad, x_halo, wc, bc, w2, b2)

    try:
        out = _call(True)
    except Exception:
        out = _call(False)   # fall back to default double-buffered weight blocks

    return out[:, :L, :dim]


def ffn_reference(x, conv_w, conv_b, lin_w, lin_b, kernel_size):
    """Pure-JAX (f32) reference reproducing the PyTorch forward."""
    pad = kernel_size // 2
    xc = jnp.transpose(x, (0, 2, 1))                          # (B, dim, L)
    h = lax.conv_general_dilated(
        xc, conv_w, window_strides=(1,), padding=[(pad, pad)],
        dimension_numbers=("NCH", "OIH", "NCH"))
    h = h + conv_b[None, :, None]
    h = 0.5 * h * (1.0 + lax.erf(h / math.sqrt(2.0)))
    h = jnp.transpose(h, (0, 2, 1))                           # (B, L, hidden)
    return h @ lin_w.T + lin_b


def _make_inputs(key, B, L, dim, hidden, k, scale=0.1):
    k1, k2, k3, k4, k5 = jax.random.split(key, 5)
    x = jax.random.normal(k1, (B, L, dim), dtype=jnp.float32)
    conv_w = scale * jax.random.normal(k2, (hidden, dim, k), dtype=jnp.float32)
    conv_b = scale * jax.random.normal(k3, (hidden,), dtype=jnp.float32)
    lin_w = scale * jax.random.normal(k4, (dim, hidden), dtype=jnp.float32)
    lin_b = scale * jax.random.normal(k5, (dim,), dtype=jnp.float32)
    return x, conv_w, conv_b, lin_w, lin_b


if __name__ == "__main__":
    key = jax.random.PRNGKey(0)
    key1, key2, key3 = jax.random.split(key, 3)

    # Test 1: small spec-like shapes (single sequence tile).
    B, L, dim, hidden, k = 2, 16, 8, 32, 3
    x, cw, cb, lw, lb = _make_inputs(key1, B, L, dim, hidden, k)
    out = jax.block_until_ready(ffn_pallas(x, cw, cb, lw, lb, k))
    ref = ffn_reference(x, cw, cb, lw, lb, k)
    assert out.shape == (B, L, dim)
    assert jnp.allclose(out, ref, atol=2e-2, rtol=2e-2), "mismatch vs reference (test 1)"

    # Test 2: multi-tile sequence path (NL > 1) and the trailing-tile slice.
    B, L, dim, hidden, k = 2, 40, 8, 32, 3
    x, cw, cb, lw, lb = _make_inputs(key2, B, L, dim, hidden, k)
    out = jax.block_until_ready(ffn_pallas(x, cw, cb, lw, lb, k, seq_tile=16))
    ref = ffn_reference(x, cw, cb, lw, lb, k)
    assert out.shape == (B, L, dim)
    assert jnp.allclose(out, ref, atol=2e-2, rtol=2e-2), "mismatch vs reference (test 2)"

    # Test 3: lane-dense dim (=128) and the in-kernel hidden-chunk path (NH > 1).
    B, L, dim, hidden, k = 2, 96, 128, 2048, 3
    x, cw, cb, lw, lb = _make_inputs(key3, B, L, dim, hidden, k)
    out = jax.block_until_ready(ffn_pallas(x, cw, cb, lw, lb, k))
    ref = ffn_reference(x, cw, cb, lw, lb, k)
    assert out.shape == (B, L, dim)
    # bf16 MXU operands: abs error grows ~sqrt(hidden); loose max-abs + tight rel-L2.
    assert jnp.allclose(out, ref, atol=2e-1, rtol=5e-2), "mismatch vs reference (test 3)"
    rel_l2 = jnp.linalg.norm(out - ref) / jnp.linalg.norm(ref)
    assert rel_l2 < 2e-2, f"relative L2 error too large: {rel_l2}"

    print("KERNEL_OK")
</pallas_src>

<mosaic_0001>
module attributes {stable_mosaic.version = 11 : i64} {
  func.func @_ffn_kernel(%arg0: i32, %arg1: i32, %arg2: memref<1x16x128xbf16, #tpu.memory_space<vmem>>, %arg3: memref<1x1x2x128xbf16, #tpu.memory_space<vmem>>, %arg4: memref<1x384x128xbf16, #tpu.memory_space<vmem>>, %arg5: memref<1x1x128xf32, #tpu.memory_space<vmem>>, %arg6: memref<1x128x128xbf16, #tpu.memory_space<vmem>>, %arg7: memref<1x128xf32, #tpu.memory_space<vmem>>, %arg8: memref<1x16x128xf32, #tpu.memory_space<vmem>>) attributes {dimension_semantics = [#tpu.dimension_semantics<parallel>, #tpu.dimension_semantics<parallel>], iteration_bounds = array<i64: 2, 1>, scalar_prefetch = 0 : i64, scratch_operands = 0 : i64, tpu.core_type = #tpu.core_type<tc>, window_params = [{transform_indices = @transform_0, window_bounds = array<i64: 1, 16, 128>}, {transform_indices = @transform_1, window_bounds = array<i64: 1, 1, 2, 128>}, {pipeline_mode = #tpu.pipeline_mode<synchronous>, transform_indices = @transform_2, window_bounds = array<i64: 1, 384, 128>}, {pipeline_mode = #tpu.pipeline_mode<synchronous>, transform_indices = @transform_3, window_bounds = array<i64: 1, 1, 128>}, {pipeline_mode = #tpu.pipeline_mode<synchronous>, transform_indices = @transform_4, window_bounds = array<i64: 1, 128, 128>}, {pipeline_mode = #tpu.pipeline_mode<synchronous>, transform_indices = @transform_5, window_bounds = array<i64: 1, 128>}, {transform_indices = @transform_6, window_bounds = array<i64: 1, 16, 128>}]} {
    %c0 = arith.constant 0 : index
    %c0_0 = arith.constant 0 : index
    %c0_1 = arith.constant 0 : index
    %0 = vector.load %arg2[%c0, %c0_0, %c0_1] : memref<1x16x128xbf16, #tpu.memory_space<vmem>>, vector<1x16x128xbf16>
    %1 = vector.shape_cast %0 : vector<1x16x128xbf16> to vector<16x128xbf16>
    %c0_2 = arith.constant 0 : index
    %c0_3 = arith.constant 0 : index
    %c0_4 = arith.constant 0 : index
    %c0_5 = arith.constant 0 : index
    %2 = vector.load %arg3[%c0_2, %c0_3, %c0_4, %c0_5] : memref<1x1x2x128xbf16, #tpu.memory_space<vmem>>, vector<1x1x2x128xbf16>
    %3 = vector.shape_cast %2 : vector<1x1x2x128xbf16> to vector<2x128xbf16>
    %4 = tpu.concatenate %1, %3 in 0 : vector<16x128xbf16>, vector<2x128xbf16> -> vector<18x128xbf16>
    %5 = vector.extract_strided_slice %4 {offsets = [0, 0], sizes = [16, 128], strides = [1, 1]} : vector<18x128xbf16> to vector<16x128xbf16>
    %6 = vector.extract_strided_slice %4 {offsets = [1, 0], sizes = [16, 128], strides = [1, 1]} : vector<18x128xbf16> to vector<16x128xbf16>
    %7 = vector.extract_strided_slice %4 {offsets = [2, 0], sizes = [16, 128], strides = [1, 1]} : vector<18x128xbf16> to vector<16x128xbf16>
    %8 = tpu.concatenate %5, %6, %7 in 1 : vector<16x128xbf16>, vector<16x128xbf16>, vector<16x128xbf16> -> vector<16x384xbf16>
    %c0_6 = arith.constant 0 : index
    %c0_7 = arith.constant 0 : index
    %c0_8 = arith.constant 0 : index
    %9 = vector.load %arg4[%c0_6, %c0_7, %c0_8] : memref<1x384x128xbf16, #tpu.memory_space<vmem>>, vector<1x384x128xbf16>
    %10 = vector.shape_cast %9 : vector<1x384x128xbf16> to vector<384x128xbf16>
    %cst = arith.constant dense<0.000000e+00> : vector<16x128xf32>
    %11 = tpu.matmul %8, %10, %cst {dimension_numbers = #tpu.dot_dimension_numbers<[1], [0], [0], [1], [0, 0, 1, 1], [], []>} : vector<16x384xbf16>, vector<384x128xbf16>, vector<16x128xf32> -> vector<16x128xf32>
    %c0_9 = arith.constant 0 : index
    %c0_10 = arith.constant 0 : index
    %c0_11 = arith.constant 0 : index
    %12 = vector.load %arg5[%c0_9, %c0_10, %c0_11] : memref<1x1x128xf32, #tpu.memory_space<vmem>>, vector<1x1x128xf32>
    %13 = vector.shape_cast %12 : vector<1x1x128xf32> to vector<1x128xf32>
    %14 = vector.broadcast %13 : vector<1x128xf32> to vector<16x128xf32>
    %15 = arith.addf %11, %14 : vector<16x128xf32>
    %cst_12 = arith.constant 5.000000e-01 : f32
    %16 = vector.broadcast %cst_12 : f32 to vector<16x128xf32>
    %17 = arith.mulf %16, %15 : vector<16x128xf32>
    %cst_13 = arith.constant 0.707106769 : f32
    %18 = vector.broadcast %cst_13 : f32 to vector<16x128xf32>
    %19 = arith.mulf %15, %18 : vector<16x128xf32>
    %20 = math.erf %19 : vector<16x128xf32>
    %cst_14 = arith.constant 1.000000e+00 : f32
    %21 = vector.broadcast %cst_14 : f32 to vector<16x128xf32>
    %22 = arith.addf %21, %20 : vector<16x128xf32>
    %23 = arith.mulf %17, %22 : vector<16x128xf32>
    %24 = arith.truncf %23 : vector<16x128xf32> to vector<16x128xbf16>
    %c0_15 = arith.constant 0 : index
    %c0_16 = arith.constant 0 : index
    %c0_17 = arith.constant 0 : index
    %25 = vector.load %arg6[%c0_15, %c0_16, %c0_17] : memref<1x128x128xbf16, #tpu.memory_space<vmem>>, vector<1x128x128xbf16>
    %26 = vector.shape_cast %25 : vector<1x128x128xbf16> to vector<128x128xbf16>
    %cst_18 = arith.constant dense<0.000000e+00> : vector<16x128xf32>
    %27 = tpu.matmul %24, %26, %cst_18 {dimension_numbers = #tpu.dot_dimension_numbers<[1], [0], [0], [1], [0, 0, 1, 1], [], []>} : vector<16x128xbf16>, vector<128x128xbf16>, vector<16x128xf32> -> vector<16x128xf32>
    %c0_19 = arith.constant 0 : index
    %c0_20 = arith.constant 0 : index
    %28 = vector.load %arg7[%c0_19, %c0_20] : memref<1x128xf32, #tpu.memory_space<vmem>>, vector<1x128xf32>
    %29 = vector.broadcast %28 : vector<1x128xf32> to vector<16x128xf32>
    %30 = arith.addf %27, %29 : vector<16x128xf32>
    %c0_21 = arith.constant 0 : index
    %c0_22 = arith.constant 0 : index
    %c0_23 = arith.constant 0 : index
    %31 = vector.load %arg8[%c0_21, %c0_22, %c0_23] : memref<1x16x128xf32, #tpu.memory_space<vmem>>, vector<1x16x128xf32>
    %32 = vector.shape_cast %31 : vector<1x16x128xf32> to vector<16x128xf32>
    %33 = vector.shape_cast %30 : vector<16x128xf32> to vector<1x16x128xf32>
    tpu.vector_store %arg8[%c0_21, %c0_22, %c0_23], %33 {strides = array<i32>} : memref<1x16x128xf32, #tpu.memory_space<vmem>>, vector<1x16x128xf32>,
    return
  }
  func.func @transform_0(%arg0: i32, %arg1: i32) -> (i32, i32, i32) {
    %c0_i32 = arith.constant 0 : i32
    %c0_i32_0 = arith.constant 0 : i32
    return %arg0, %arg1, %c0_i32 : i32, i32, i32
  }
  func.func @transform_1(%arg0: i32, %arg1: i32) -> (i32, i32, i32, i32) {
    %c0_i32 = arith.constant 0 : i32
    %c0_i32_0 = arith.constant 0 : i32
    %c0_i32_1 = arith.constant 0 : i32
    return %arg0, %arg1, %c0_i32, %c0_i32_0 : i32, i32, i32, i32
  }
  func.func @transform_2(%arg0: i32, %arg1: i32) -> (i32, i32, i32) {
    %c0_i32 = arith.constant 0 : i32
    %c0_i32_0 = arith.constant 0 : i32
    %c0_i32_1 = arith.constant 0 : i32
    %c0_i32_2 = arith.constant 0 : i32
    return %c0_i32, %c0_i32_0, %c0_i32_1 : i32, i32, i32
  }
  func.func @transform_3(%arg0: i32, %arg1: i32) -> (i32, i32, i32) {
    %c0_i32 = arith.constant 0 : i32
    %c0_i32_0 = arith.constant 0 : i32
    %c0_i32_1 = arith.constant 0 : i32
    %c0_i32_2 = arith.constant 0 : i32
    return %c0_i32, %c0_i32_0, %c0_i32_1 : i32, i32, i32
  }
  func.func @transform_4(%arg0: i32, %arg1: i32) -> (i32, i32, i32) {
    %c0_i32 = arith.constant 0 : i32
    %c0_i32_0 = arith.constant 0 : i32
    %c0_i32_1 = arith.constant 0 : i32
    %c0_i32_2 = arith.constant 0 : i32
    return %c0_i32, %c0_i32_0, %c0_i32_1 : i32, i32, i32
  }
  func.func @transform_5(%arg0: i32, %arg1: i32) -> (i32, i32) {
    %c0_i32 = arith.constant 0 : i32
    %c0_i32_0 = arith.constant 0 : i32
    %c0_i32_1 = arith.constant 0 : i32
    return %c0_i32, %c0_i32_0 : i32, i32
  }
  func.func @transform_6(%arg0: i32, %arg1: i32) -> (i32, i32, i32) {
    %c0_i32 = arith.constant 0 : i32
    %c0_i32_0 = arith.constant 0 : i32
    return %arg0, %arg1, %c0_i32 : i32, i32, i32
  }
}

module attributes {stable_mosaic.version = 11 : i64} {
  func.func @_ffn_kernel(%arg0: i32, %arg1: i32, %arg2: memref<1x16x128xbf16, #tpu.memory_space<vmem>>, %arg3: memref<1x1x2x128xbf16, #tpu.memory_space<vmem>>, %arg4: memref<1x384x128xbf16, #tpu.memory_space<vmem>>, %arg5: memref<1x1x128xf32, #tpu.memory_space<vmem>>, %arg6: memref<1x128x128xbf16, #tpu.memory_space<vmem>>, %arg7: memref<1x128xf32, #tpu.memory_space<vmem>>, %arg8: memref<1x16x128xf32, #tpu.memory_space<vmem>>) attributes {dimension_semantics = [#tpu.dimension_semantics<parallel>, #tpu.dimension_semantics<parallel>], iteration_bounds = array<i64: 2, 1>, scalar_prefetch = 0 : i64, scratch_operands = 0 : i64, tpu.core_type = #tpu.core_type<tc>, window_params = [{transform_indices = @transform_0, window_bounds = array<i64: 1, 16, 128>}, {transform_indices = @transform_1, window_bounds = array<i64: 1, 1, 2, 128>}, {pipeline_mode = #tpu.pipeline_mode<synchronous>, transform_indices = @transform_2, window_bounds = array<i64: 1, 384, 128>}, {pipeline_mode = #tpu.pipeline_mode<synchronous>, transform_indices = @transform_3, window_bounds = array<i64: 1, 1, 128>}, {pipeline_mode = #tpu.pipeline_mode<synchronous>, transform_indices = @transform_4, window_bounds = array<i64: 1, 128, 128>}, {pipeline_mode = #tpu.pipeline_mode<synchronous>, transform_indices = @transform_5, window_bounds = array<i64: 1, 128>}, {transform_indices = @transform_6, window_bounds = array<i64: 1, 16, 128>}]} {
    %c0 = arith.constant 0 : index
    %c0_0 = arith.constant 0 : index
    %c0_1 = arith.constant 0 : index
    %0 = vector.load %arg2[%c0, %c0_0, %c0_1] : memref<1x16x128xbf16, #tpu.memory_space<vmem>>, vector<1x16x128xbf16>
    %1 = vector.shape_cast %0 : vector<1x16x128xbf16> to vector<16x128xbf16>
    %c0_2 = arith.constant 0 : index
    %c0_3 = arith.constant 0 : index
    %c0_4 = arith.constant 0 : index
    %c0_5 = arith.constant 0 : index
    %2 = vector.load %arg3[%c0_2, %c0_3, %c0_4, %c0_5] : memref<1x1x2x128xbf16, #tpu.memory_space<vmem>>, vector<1x1x2x128xbf16>
    %3 = vector.shape_cast %2 : vector<1x1x2x128xbf16> to vector<2x128xbf16>
    %4 = tpu.concatenate %1, %3 in 0 : vector<16x128xbf16>, vector<2x128xbf16> -> vector<18x128xbf16>
    %5 = vector.extract_strided_slice %4 {offsets = [0, 0], sizes = [16, 128], strides = [1, 1]} : vector<18x128xbf16> to vector<16x128xbf16>
    %6 = vector.extract_strided_slice %4 {offsets = [1, 0], sizes = [16, 128], strides = [1, 1]} : vector<18x128xbf16> to vector<16x128xbf16>
    %7 = vector.extract_strided_slice %4 {offsets = [2, 0], sizes = [16, 128], strides = [1, 1]} : vector<18x128xbf16> to vector<16x128xbf16>
    %8 = tpu.concatenate %5, %6, %7 in 1 : vector<16x128xbf16>, vector<16x128xbf16>, vector<16x128xbf16> -> vector<16x384xbf16>
    %c0_6 = arith.constant 0 : index
    %c0_7 = arith.constant 0 : index
    %c0_8 = arith.constant 0 : index
    %9 = vector.load %arg4[%c0_6, %c0_7, %c0_8] : memref<1x384x128xbf16, #tpu.memory_space<vmem>>, vector<1x384x128xbf16>
    %10 = vector.shape_cast %9 : vector<1x384x128xbf16> to vector<384x128xbf16>
    %cst = arith.constant dense<0.000000e+00> : vector<16x128xf32>
    %11 = tpu.matmul %8, %10, %cst {dimension_numbers = #tpu.dot_dimension_numbers<[1], [0], [0], [1], [0, 0, 1, 1], [], []>} : vector<16x384xbf16>, vector<384x128xbf16>, vector<16x128xf32> -> vector<16x128xf32>
    %c0_9 = arith.constant 0 : index
    %c0_10 = arith.constant 0 : index
    %c0_11 = arith.constant 0 : index
    %12 = vector.load %arg5[%c0_9, %c0_10, %c0_11] : memref<1x1x128xf32, #tpu.memory_space<vmem>>, vector<1x1x128xf32>
    %13 = vector.shape_cast %12 : vector<1x1x128xf32> to vector<1x128xf32>
    %14 = vector.broadcast %13 : vector<1x128xf32> to vector<16x128xf32>
    %15 = arith.addf %11, %14 : vector<16x128xf32>
    %cst_12 = arith.constant 5.000000e-01 : f32
    %16 = vector.broadcast %cst_12 : f32 to vector<16x128xf32>
    %17 = arith.mulf %16, %15 : vector<16x128xf32>
    %cst_13 = arith.constant 0.707106769 : f32
    %18 = vector.broadcast %cst_13 : f32 to vector<16x128xf32>
    %19 = arith.mulf %15, %18 : vector<16x128xf32>
    %20 = math.erf %19 : vector<16x128xf32>
    %cst_14 = arith.constant 1.000000e+00 : f32
    %21 = vector.broadcast %cst_14 : f32 to vector<16x128xf32>
    %22 = arith.addf %21, %20 : vector<16x128xf32>
    %23 = arith.mulf %17, %22 : vector<16x128xf32>
    %24 = arith.truncf %23 : vector<16x128xf32> to vector<16x128xbf16>
    %c0_15 = arith.constant 0 : index
    %c0_16 = arith.constant 0 : index
    %c0_17 = arith.constant 0 : index
    %25 = vector.load %arg6[%c0_15, %c0_16, %c0_17] : memref<1x128x128xbf16, #tpu.memory_space<vmem>>, vector<1x128x128xbf16>
    %26 = vector.shape_cast %25 : vector<1x128x128xbf16> to vector<128x128xbf16>
    %cst_18 = arith.constant dense<0.000000e+00> : vector<16x128xf32>
    %27 = tpu.matmul %24, %26, %cst_18 {dimension_numbers = #tpu.dot_dimension_numbers<[1], [0], [0], [1], [0, 0, 1, 1], [], []>} : vector<16x128xbf16>, vector<128x128xbf16>, vector<16x128xf32> -> vector<16x128xf32>
    %c0_19 = arith.constant 0 : index
    %c0_20 = arith.constant 0 : index
    %28 = vector.load %arg7[%c0_19, %c0_20] : memref<1x128xf32, #tpu.memory_space<vmem>>, vector<1x128xf32>
    %29 = vector.broadcast %28 : vector<1x128xf32> to vector<16x128xf32>
    %30 = arith.addf %27, %29 : vector<16x128xf32>
    %c0_21 = arith.constant 0 : index
    %c0_22 = arith.constant 0 : index
    %c0_23 = arith.constant 0 : index
    %31 = vector.load %arg8[%c0_21, %c0_22, %c0_23] : memref<1x16x128xf32, #tpu.memory_space<vmem>>, vector<1x16x128xf32>
    %32 = vector.shape_cast %31 : vector<1x16x128xf32> to vector<16x128xf32>
    %33 = vector.shape_cast %30 : vector<16x128xf32> to vector<1x16x128xf32>
    tpu.vector_store %arg8[%c0_21, %c0_22, %c0_23], %33 {strides = array<i32>} : memref<1x16x128xf32, #tpu.memory_space<vmem>>, vector<1x16x128xf32>,
    return
  }
  func.func @transform_0(%arg0: i32, %arg1: i32) -> (i32, i32, i32) {
    %c0_i32 = arith.constant 0 : i32
    %c0_i32_0 = arith.constant 0 : i32
    return %arg0, %arg1, %c0_i32 : i32, i32, i32
  }
  func.func @transform_1(%arg0: i32, %arg1: i32) -> (i32, i32, i32, i32) {
    %c0_i32 = arith.constant 0 : i32
    %c0_i32_0 = arith.constant 0 : i32
    %c0_i32_1 = arith.constant 0 : i32
    return %arg0, %arg1, %c0_i32, %c0_i32_0 : i32, i32, i32, i32
  }
  func.func @transform_2(%arg0: i32, %arg1: i32) -> (i32, i32, i32) {
    %c0_i32 = arith.constant 0 : i32
    %c0_i32_0 = arith.constant 0 : i32
    %c0_i32_1 = arith.constant 0 : i32
    %c0_i32_2 = arith.constant 0 : i32
    return %c0_i32, %c0_i32_0, %c0_i32_1 : i32, i32, i32
  }
  func.func @transform_3(%arg0: i32, %arg1: i32) -> (i32, i32, i32) {
    %c0_i32 = arith.constant 0 : i32
    %c0_i32_0 = arith.constant 0 : i32
    %c0_i32_1 = arith.constant 0 : i32
    %c0_i32_2 = arith.constant 0 : i32
    return %c0_i32, %c0_i32_0, %c0_i32_1 : i32, i32, i32
  }
  func.func @transform_4(%arg0: i32, %arg1: i32) -> (i32, i32, i32) {
    %c0_i32 = arith.constant 0 : i32
    %c0_i32_0 = arith.constant 0 : i32
    %c0_i32_1 = arith.constant 0 : i32
    %c0_i32_2 = arith.constant 0 : i32
    return %c0_i32, %c0_i32_0, %c0_i32_1 : i32, i32, i32
  }
  func.func @transform_5(%arg0: i32, %arg1: i32) -> (i32, i32) {
    %c0_i32 = arith.constant 0 : i32
    %c0_i32_0 = arith.constant 0 : i32
    %c0_i32_1 = arith.constant 0 : i32
    return %c0_i32, %c0_i32_0 : i32, i32
  }
  func.func @transform_6(%arg0: i32, %arg1: i32) -> (i32, i32, i32) {
    %c0_i32 = arith.constant 0 : i32
    %c0_i32_0 = arith.constant 0 : i32
    return %arg0, %arg1, %c0_i32 : i32, i32, i32
  }
}

</mosaic_0001>

<bundles_post_ra>
// kernel: tpu_custom_call.1
= control target key start
LH: loop header
LB: loop body
LE: loop exit
PB: predicated region body
PF: predicated region fallthrough
CT: control target
= control target key end

     0   :  { %11 = vsyncpa [#allocation3], 0  ;;  %s1582_s0 = inlined_call_operand.vmem [shape: bf16[2,18,128], index: 0, kind: input, shape index: {}]   ;;  %s1583_s1 = inlined_call_operand.vmem [shape: bf16[2,1,2,128], index: 1, kind: input, shape index: {}]   ;;  %s1584_s2 = inlined_call_operand.hbm [shape: bf16[1,384,128], index: 2, kind: input, shape index: {}]   ;;  %s1585_s3 = inlined_call_operand.vmem [shape: f32[1,1,128], index: 3, kind: input, shape index: {}]   ;;  %s1586_s4 = inlined_call_operand.hbm [shape: bf16[1,128,128], index: 4, kind: input, shape index: {}]   ;;  %s1587_s5 = inlined_call_operand.vmem [shape: f32[1,128], index: 5, kind: input, shape index: {}]   ;;  %s1588_s6 = inlined_call_operand.hbm [shape: f32[2,16,128], index: 6, kind: output, shape index: {}]  }
   0x1   :  { %12 = vsyncpa [#allocation6], 0 }
   0x2   :  { %13 = vsyncpa [#allocation4], 0 }
   0x3   :  { %15 = vsyncpa [#allocation4 + $0x1], 0  ;;  %s1361_s21 = smov 0   ;;  %s1363_s22 = smov 0  }
   0x4   :  { %s1365_s23 = smov 0   ;;  %s1367_s24 = smov 0  }
   0x5   :  { %s1369_s25 = smov 0   ;;  %s1371_s26 = smov 0  }
   0x6 LB: > { %1595 = sst [smem:[#allocation11_spill]] %s1311_s25  ;;  %s921_s27 = sadd.s32 4294967295, %s1315_s26   ;;  %s1315_s26 = sphi %s1371_s26, %s21_s26   ;;  %s1311_s25 = sphi %s1369_s25, %s1607_s25   ;;  %s1307_s24 = sphi %s1367_s24, %s1606_s24   ;;  %s1303_s23 = sphi %s1365_s23, %s1610_s23   ;;  %s1299_s22 = sphi %s1363_s22, %s1609_s22   ;;  %s1295_s21 = sphi %s1361_s21, %s1608_s21  }
   0x7   : > { %s922_s28 = sadd.s32 4294967294, %s1315_s26   ;;  %s33_s29 = sadd.s32 1, %s1311_s25 }
   0x8   : > { %s182_s30 = sadd.s32 1, %s1303_s23  ;;  %p35_p0 = scmp.ge.s32.totalorder %s33_s29, 2 }
   0x9   : > { %p192_p1 = scmp.ne.s32.totalorder %s1303_s23, %s1299_s22  ;;  %p193_p2 = scmp.eq.s32.totalorder %s921_s27, 1 }
   0xa   : > { %p198_p3 = scmp.ne.s32.totalorder %s1299_s22, %s1295_s21  ;;  %s1612_s29 = smov (%p35_p0, %s33_s29), 0 }
   0xb   : > { %1596 = sst [smem:[#allocation12_spill]] %s1612_s29  ;;  %p1401_p4 = por %p193_p2, %p192_p1 }
   0xc   : > { %p199_p5 = scmp.eq.s32.totalorder %s922_s28, 1  ;;  %s177_s8 = ssub.s32 %s1311_s25, %s1612_s29 }
   0xd   : > { %s1597_s7 = scalar_select %p1401_p4, 1, 0 }
   0xe   : > { %p923_p6 = scmp.ge.s32.totalorder %s1315_s26, 1  ;;  %p180_p7 = scmp.eq.s32.totalorder %s177_s8, 0 }
   0xf   : > { %p1408_p8 = por %p199_p5, %p198_p3  ;;  %p206_p9 = scmp.lt.s32.totalorder %s1315_s26, 3 }
  0x10   : > { %s1414_s10 = scalar_select %p180_p7, %s1303_s23, %s182_s30  }
  0x11   : > { %s1598_s9 = scalar_select %p1408_p8, 1, 0 }
  0x12   : > { %p1416_p10 = pnand %p923_p6, %p206_p9  ;;  %p1420_p11 = scmp.eq.s32.totalorder %s921_s27, 0 }
  0x13   : > { %s1317_s13 = smov [#allocation2]   ;;  %s1318_s16 = smov [#allocation5]  }
  0x14   : > { %s1599_s11 = scalar_select %p1416_p10, 1, 0 }
  0x15   : > { %s1600_s12 = scalar_select %p1420_p11, 1, 0 }
  0x16   : > { %p1064_p12 = pneg %p1416_p10  ;;  %s218_s14 = sshll.u32 %s1317_s13, 4  ;;  %s219_s14 = int_to_ptr.vmem [resolvable:$true] %s218_s14 }
  0x17   : > { %s234_s17 = sshll.u32 %s1318_s16, 4  ;;  %s1173_s20 = scalar_lea.hbm %s1584_s2, 3072  ;;  %s1432_s17 = int_to_ptr.vmem [resolvable:$true] %s234_s17 }
  0x18   : > { %p1428_p13 = pnand %p1420_p11, %p1064_p12  ;;  %p1174_p0 = scmp.ne.s32.totalorder %s1584_s2, %s1173_s20 }
  0x19   : > { %p1180_p5 = scmp.lt.u32.totalorder %s1173_s20, %s1584_s2 }
  0x1a   : > { %p1175_p1 = pneg %p1428_p13 }
  0x1c   : > { %p1176_p2 = pnand %p1175_p1, %p1174_p0 }
  0x1e   : > { %p1177_p3 = pneg %p1176_p2 }
  0x20   : > { %p1182_p6 = pnand %p1180_p5, %p1177_p3 }
  0x22   : > { %1185 = shalt.err (!%p1182_p6)
}
  0x23   : > { %s1186_s13 = scalar_lea.vmem %s219_s14, 3072  ;;  %p1194_p8 = scmp.lt.s32.totalorder %s219_s14, %s219_s14 }
  0x24   : > { %p1187_p7 = scmp.ne.s32.totalorder %s219_s14, %s1186_s13  ;;  %p1195_p4 = scmp.lt.s32.totalorder %s1186_s13, %s1186_s13 }
  0x26   : > { %p1189_p9 = pnand %p1187_p7, %p1175_p1  ;;  %p1196_p11 = por %p1195_p4, %p1194_p8 }
  0x28   : > { %p1190_p12 = pneg %p1189_p9 }
  0x2a   : > { %p1197_p10 = pnand %p1196_p11, %p1190_p12 }
  0x2c   : > { %1200 = shalt.err (!%p1197_p10)
}
  0x2d   : > { %s1319_s16 = smov 64   ;;  %s1320_s18 = smov 4  }
  0x2e   : > { %1067 = dma.hbm_to_vmem [thread:$0]  (!%p1428_p13), %s1584_s2, 3072, %s219_s14, [#allocation3], %s1319_s16, %s1319_s16, %s1320_s18  }
  0x2f   : > { %s1201_s30 = scalar_lea.hbm %s1586_s4, 1024 }
  0x30   : > { %p1202_p0 = scmp.ne.s32.totalorder %s1586_s4, %s1201_s30  ;;  %p1208_p10 = scmp.lt.u32.totalorder %s1201_s30, %s1586_s4 }
  0x32   : > { %p1204_p4 = pnand %p1202_p0, %p1175_p1 }
  0x34   : > { %p1205_p8 = pneg %p1204_p4 }
  0x36   : > { %p1210_p11 = pnand %p1208_p10, %p1205_p8 }
  0x38   : > { %1213 = shalt.err (!%p1210_p11)
}
  0x39   : > { %s1214_s14 = scalar_lea.vmem %s1432_s17, 1024  ;;  %p1222_p6 = scmp.lt.s32.totalorder %s1432_s17, %s1432_s17 }
  0x3a   : > { %p1215_p2 = scmp.ne.s32.totalorder %s1432_s17, %s1214_s14  ;;  %p1223_p7 = scmp.lt.s32.totalorder %s1214_s14, %s1214_s14 }
  0x3c   : > { %p1217_p3 = pnand %p1215_p2, %p1175_p1  ;;  %p1224_p9 = por %p1223_p7, %p1222_p6 }
  0x3e   : > { %p1218_p5 = pneg %p1217_p3 }
  0x40   : > { %p1225_p12 = pnand %p1224_p9, %p1218_p5 }
  0x42   : > { %1228 = shalt.err (!%p1225_p12)
}
  0x43   : > { %1070 = dma.hbm_to_vmem [thread:$0]  (!%p1428_p13), %s1586_s4, 1024, %s1432_s17, [#allocation6], %s1319_s16, %s1319_s16, %s1320_s18  }
  0x44   : > { %p1602_p0 = scmp.ne.s32.totalorder %s1599_s11, 0 }
  0x45   : > { %p1603_p4 = scmp.ne.s32.totalorder (!%p1602_p0), %s1600_s12, 0 }
  0x46   : > { %283 = sbr.rel (%p1602_p0) target bundleno = 585 (0x249), region = 44 }
  0x4d   : > { %1282 = dma.done.wait (%p1603_p4), [#allocation3], 3072  }
  0x4e   : > { %1284 = vsyncadd (%p1603_p4), [#allocation3], 4294964224 }
  0x4f   : > { %1286 = dma.done.wait (%p1603_p4), [#allocation6], 1024  }
  0x50   : > { %1288 = vsyncadd (%p1603_p4), [#allocation6], 4294966272  ;;  %v1321_v0 = vmov 0.0   ;;  %vm1322_vm0 = vmmov 0   ;;  %v1136_v1 = vld [vmem:[#allocation2 + $0x40] sm:$0xff]   ;;  %v1139_v4 = vld [vmem:[#allocation2 + $0x48] sm:$0xff]  }
  0x51   : > { %1013 = vmatprep.subr.bf16.mxu1 %v1321_v0  ;;  %1029 = vmatprep.mubr.msk.bf16.mxu1 %vm1322_vm0, %v1321_v0  ;;  %v1137_v2 = vld [vmem:[#allocation2] sm:$0xff]   ;;  %v1140_v5 = vld [vmem:[#allocation2 + $0x8] sm:$0xff]   ;;  %v1142_v7 = vld [vmem:[#allocation2 + $0x50] sm:$0xff]   ;;  %p336_p13 = scmp.lt.s32.totalorder %s1307_s24, 1  ;;  %vm366_vm1 = vsmask.f32 7424 }
  0x52   : > { %973 = vmatprep.subr.bf16.mxu0 %v1136_v1  ;;  %v1138_v3 = vld [vmem:[#allocation2 + $0x80] sm:$0xff]   ;;  %v1141_v6 = vld [vmem:[#allocation2 + $0x88] sm:$0xff]   ;;  %v1143_v8 = vld [vmem:[#allocation2 + $0x10] sm:$0xff]   ;;  %vm381_vm2 = vcmask 1046528   ;;  %s328_s30 = sand.u32 1, %s1299_s22   ;;  %p1604_p8 = scmp.ne.s32.totalorder %s1597_s7, 0 }
  0x53   : > { %974 = vmatpush3.bf16.msra.mxu0 %v1137_v2  ;;  %1014 = vmatpush3.bf16.msra.mxu1 %v1138_v3  ;;  %v1144_v9 = vld [vmem:[#allocation2 + $0x90] sm:$0xff]   ;;  %v1145_v10 = vld [vmem:[#allocation2 + $0x58] sm:$0xff]   ;;  %v1148_v13 = vld [vmem:[#allocation2 + $0x60] sm:$0xff]   ;;  %s337_s11 = scalar_select %p336_p13, %s1307_s24, 1 }
  0x54   : > { %975 = vmatprep.subr.bf16.mxu0 %v1139_v4  ;;  %1015 = vmatprep.subr.bf16.mxu1 %v1321_v0  ;;  %v1146_v11 = vld [vmem:[#allocation2 + $0x18] sm:$0xff]   ;;  %v1149_v14 = vld [vmem:[#allocation2 + $0x20] sm:$0xff]   ;;  %v1151_v16 = vld [vmem:[#allocation2 + $0x68] sm:$0xff]   ;;  %s930_s8 = sshll.u32 %s328_s30, 4  ;;  %s1323_s18 = smov [#allocation7]  }
  0x55   : > { %v1147_v12 = vld [vmem:[#allocation2 + $0x98] sm:$0xff]   ;;  %v1150_v15 = vld [vmem:[#allocation2 + $0xa0] sm:$0xff]   ;;  %s1053_s12 = smul.u32 12, %s337_s11  ;;  %v1152_v17 = vld [vmem:[#allocation2 + $0x28] sm:$0xff]   ;;  %s354_s16 = scalar_lea.vmem %s1583_s1, %s337_s11 }
  0x56   : > { %v1153_v18 = vld [vmem:[#allocation2 + $0xa8] sm:$0xff]   ;;  %v1154_v19 = vld [vmem:[#allocation2 + $0x70] sm:$0xff]   ;;  %v1157_v22 = vld [vmem:[#allocation2 + $0x78] sm:$0xff]   ;;  %s330_s25 = scalar_lea.vmem [#allocation7], %s930_s8  ;;  %s972_s11 = sshll.u32 %s1307_s24, 8 }
  0x57   : > { %976 = vmatpush3.bf16.msra.mxu0 %v1140_v5  ;;  %1016 = vmatpush3.bf16.msra.mxu1 %v1141_v6  ;;  %v1155_v20 = vld [vmem:[#allocation2 + $0x30] sm:$0xff]   ;;  %s343_s20 = scalar_lea.vmem %s1582_s0, %s1053_s12  ;;  %v359_v23 = vld [vmem:[%s354_s16] sm:$0x1]  ;;  %v1158_v26 = vld [vmem:[#allocation2 + $0x38] sm:$0xff]   ;;  %s808_s29 = sshll.u32 %s330_s25, 4  ;;  %s1529_s29 = int_to_ptr.vmem [resolvable:$true] %s808_s29 }
  0x58   : > { %977 = vmatprep.subr.bf16.mxu0 %v1142_v7  ;;  %1017 = vmatprep.subr.bf16.mxu1 %v1321_v0  ;;  %v1156_v21 = vld [vmem:[#allocation2 + $0xb0] sm:$0xff]   ;;  %v1159_v24 = vld [vmem:[%s343_s20] sm:$0xff]   ;;  %v375_v25 = vshll.u32 %v359_v23, 16  ;;  %v1160_v30 = vld [vmem:[#allocation2 + $0xb8] sm:$0xff]   ;;  %v383_v31 = vrot.slane %v359_v23, 1  ;;  %s1534_s17 = scalar_lea.hbm %s1588_s6, %s972_s11  ;;  %s1536_s16 = scalar_lea.sflag [#allocation4], %s328_s30 }
  0x59   : > { %v368_v27 = vshrl.u32 %v1159_v24, 16  ;;  %v370_v28 = vshll.u32 %v1159_v24, 16  ;;  %v382_v33 = vrot.slane %v1159_v24, 1  ;;  %v1161_v34 = vld [vmem:[#allocation5] sm:$0xff]   ;;  %v1162_v38 = vld [vmem:[#allocation5 + $0x8] sm:$0xff]   ;;  %v1163_v39 = vld [vmem:[#allocation5 + $0x10] sm:$0xff]  }
  0x5a   : > { %v377_v29 = vrot.slane %v375_v25, 1  ;;  %v1164_v40 = vld [vmem:[#allocation5 + $0x18] sm:$0xff]   ;;  %v1165_v41 = vld [vmem:[#allocation5 + $0x20] sm:$0xff]   ;;  %v1166_v42 = vld [vmem:[#allocation5 + $0x28] sm:$0xff]   ;;  %s1229_s24 = scalar_lea.vmem %s1529_s29, 256  ;;  %s1233_s19 = sshll.u32 %s1323_s18, 4  ;;  %s1234_s19 = int_to_ptr.vmem [resolvable:$false] %s1233_s19 }
  0x5b   : > { %978 = vmatpush3.bf16.msra.mxu0 %v1143_v8  ;;  %1018 = vmatpush3.bf16.msra.mxu1 %v1144_v9  ;;  %v372_v32 = vrot.slane %v370_v28, 1  ;;  %v384_v37 = vsel %vm381_vm2, %v382_v33, %v383_v31  ;;  %v1167_v43 = vld [vmem:[#allocation5 + $0x30] sm:$0xff]   ;;  %v1168_v44 = vld [vmem:[#allocation5 + $0x38] sm:$0xff]   ;;  %v933_v47 = vld [vmem:[%s1585_s3] ss:$0 sm:$0xff]  ;;  %p1230_p1 = scmp.ne.s32.totalorder %s1529_s29, %s1229_s24  ;;  %s1235_s20 = scalar_lea.vmem %s1234_s19, 512 }
  0x5c   : > { %979 = vmatprep.subr.bf16.mxu0 %v1145_v10  ;;  %1019 = vmatprep.subr.bf16.mxu1 %v1321_v0  ;;  %v958_v7 = vld [vmem:[%s1587_s5] ss:$0 sm:$0xff]  ;;  %p1236_p2 = scmp.lt.s32.totalorder %s1529_s29, %s1234_s19  ;;  %p1237_p3 = scmp.lt.s32.totalorder %s1235_s20, %s1229_s24 }
  0x5d   : > { %v373_v35 = vor.u32 %v372_v32, %v368_v27  ;;  %p1231_p10 = pnand %p1230_p1, %p1604_p8 }
  0x5e   : > { %p1238_p5 = por %p1237_p3, %p1236_p2 }
  0x5f   : > { %980 = vmatpush3.bf16.msra.mxu0 %v1146_v11  ;;  %1020 = vmatpush3.bf16.msra.mxu1 %v1147_v12  ;;  %v378_v36 = vsel %vm366_vm1, %v373_v35, %v377_v29  ;;  %p1232_p11 = pneg %p1231_p10 }
  0x60   : > { %981 = vmatprep.subr.bf16.mxu0 %v1148_v13  ;;  %1021 = vmatprep.subr.bf16.mxu1 %v1321_v0 }
  0x61   : > { %617 = vmatprep.mubr.bf16.mxu0 %v378_v36  ;;  %p1239_p6 = pnand %p1238_p5, %p1232_p11 }
  0x63   : > { %982 = vmatpush3.bf16.msra.mxu0 %v1149_v14  ;;  %1022 = vmatpush3.bf16.msra.mxu1 %v1150_v15 }
  0x64   : > { %983 = vmatprep.subr.bf16.mxu0 %v1151_v16  ;;  %1023 = vmatprep.subr.bf16.mxu1 %v1321_v0 }
  0x67   : > { %984 = vmatpush3.bf16.msra.mxu0 %v1152_v17  ;;  %1024 = vmatpush3.bf16.msra.mxu1 %v1153_v18 }
  0x68   : > { %985 = vmatprep.subr.bf16.mxu0 %v1154_v19  ;;  %1025 = vmatprep.subr.bf16.mxu1 %v1321_v0 }
  0x6b   : > { %986 = vmatpush3.bf16.msra.mxu0 %v1155_v20  ;;  %1026 = vmatpush3.bf16.msra.mxu1 %v1156_v21 }
  0x6c   : > { %987 = vmatprep.subr.bf16.mxu0 %v1157_v22  ;;  %1027 = vmatprep.subr.bf16.mxu1 %v1321_v0 }
  0x6f   : > { %988 = vmatpush3.bf16.msra.mxu0 %v1158_v26  ;;  %1028 = vmatpush3.bf16.msra.mxu1 %v1160_v30 }
  0x70   : > { %1033 = vmatprep.subr.bf16.mxu0 %v1321_v0 }
  0x72   : > { %618 = vmatmul.mubr.bf16.vlgmr.msra.gmra.mrb[0].mxu0 %v1159_v24  ;;  %1030 = vmatmul.mubr.bf16.vlgmr.msra.gmra.mrb[0].mxu1 %v384_v37 }
  0x73   : > { %1034 = vmatpush3.bf16.msra.mxu0 %v1161_v34  ;;  %1049 = vmatprep.mubr.msk.bf16.mxu0 %vm1322_vm0, %v1321_v0 }
  0x74   : > { %1035 = vmatprep.subr.bf16.mxu0 %v1321_v0 }
  0x77   : > { %1036 = vmatpush3.bf16.msra.mxu0 %v1162_v38 }
  0x78   : > { %1037 = vmatprep.subr.bf16.mxu0 %v1321_v0 }
  0x7b   : > { %1038 = vmatpush3.bf16.msra.mxu0 %v1163_v39 }
  0x7c   : > { %1039 = vmatprep.subr.bf16.mxu0 %v1321_v0 }
  0x7f   : > { %1040 = vmatpush3.bf16.msra.mxu0 %v1164_v40 }
  0x80   : > { %1041 = vmatprep.subr.bf16.mxu0 %v1321_v0 }
  0x83   : > { %1042 = vmatpush3.bf16.msra.mxu0 %v1165_v41 }
  0x84   : > { %1043 = vmatprep.subr.bf16.mxu0 %v1321_v0 }
  0x87   : > { %1044 = vmatpush3.bf16.msra.mxu0 %v1166_v42 }
  0x88   : > { %1045 = vmatprep.subr.bf16.mxu0 %v1321_v0 }
  0x8b   : > { %1046 = vmatpush3.bf16.msra.mxu0 %v1167_v43 }
  0x8c   : > { %1047 = vmatprep.subr.bf16.mxu0 %v1321_v0 }
  0x8f   : > { %1048 = vmatpush3.bf16.msra.mxu0 %v1168_v44 }
 0x145   : > { %v989_v45 = vpop.f32.mrb[0].mxu0  ;;  %v660_v48 = vpop.f32.mrb[0].mxu1 }
 0x146   : > { %v990_v46 = vpop.f32.mrb[1].mxu0  ;;  %v1031_v51 = vpop.f32.mrb[1].mxu1 }
 0x147   : > { %v991_v49 = vadd.f32 %v990_v46, %v989_v45  ;;  %v992_v50 = vpop.f32.mrb[2].mxu0  ;;  %v663_v53 = vpop.f32.mrb[2].mxu1 }
 0x148   : > { %v993_v52 = vpop.f32.mrb[3].mxu0  ;;  %v1032_v56 = vpop.f32.mrb[3].mxu1 }
 0x149   : > { %v620_v54 = vadd.f32 %v991_v49, %v933_v47  ;;  %v994_v55 = vadd.f32 %v993_v52, %v992_v50 }
 0x14b   : > { %v661_v57 = vadd.f32 %v660_v48, %v620_v54  ;;  %v623_v58 = vadd.f32 %v994_v55, %v933_v47 }
 0x14d   : > { %v669_v59 = vmul.f32 0.70710677, %v661_v57  ;;  %v664_v60 = vadd.f32 %v663_v53, %v623_v58  ;;  %v667_v1 = vmul.f32 0.5, %v661_v57 }
 0x14f   : > { %1169 = verf.f32 %v669_v59  ;;  %v670_v61 = vmul.f32 0.70710677, %v664_v60  ;;  %v668_v2 = vmul.f32 0.5, %v664_v60 }
 0x151   : > { %1171 = verf.f32 %v670_v61 }
 0x159   : > { %v1170_v62 = vpop.eup %1169 }
 0x15a   : > { %v673_v63 = vadd.f32 1.0, %v1170_v62 }
 0x15b   : > { %v1172_v0 = vpop.eup %1171 }
 0x15c   : > { %v674_v3 = vadd.f32 1.0, %v1172_v0  ;;  %v675_v4 = vmul.f32 %v673_v63, %v667_v1 }
 0x15e   : > { %v676_v5 = vmul.f32 %v674_v3, %v668_v2 }
 0x160   : > { %v677_v6 = vpack.c.bf16 %v676_v5, %v675_v4 }
 0x162   : > { %1050 = vmatmul.mubr.bf16.vlgmr.msra.gmra.mrb[4].mxu0 %v677_v6 }
 0x235   : > { %v783_v8 = vpop.f32.mrb[4].mxu0 }
 0x236   : > { %v784_v9 = vadd.f32 %v958_v7, %v783_v8  ;;  %v1051_v10 = vpop.f32.mrb[5].mxu0 }
 0x237   : > { %v786_v11 = vpop.f32.mrb[6].mxu0 }
 0x238   : > { %790 = vst [vmem:[%s330_s25] sm:$0xff] %v784_v9  ;;  %v787_v12 = vadd.f32 %v958_v7, %v786_v11  ;;  %v1052_v13 = vpop.f32.mrb[7].mxu0 }
 0x23a   : > { %791 = vst [vmem:[%s330_s25 + $0x8] sm:$0xff] %v787_v12 }
 0x23b   : > { %1242 = shalt.err (!%p1239_p6)
}
 0x23c   : > { %s1243_s27 = scalar_lea.hbm %s1534_s17, 256  ;;  %s1247_s8 = scalar_lea.hbm %s1588_s6, 512 }
 0x23d   : > { %p1244_p7 = scmp.ne.s32.totalorder %s1534_s17, %s1243_s27  ;;  %p1248_p0 = scmp.lt.u32.totalorder %s1534_s17, %s1588_s6 }
 0x23e   : > { %p1249_p4 = scmp.lt.u32.totalorder %s1247_s8, %s1243_s27  ;;  %p1251_p1 = scmp.lt.u32.totalorder %s1243_s27, %s1534_s17 }
 0x23f   : > { %p1245_p9 = pnand %p1244_p7, %p1604_p8 }
 0x240   : > { %p1250_p13 = por %p1249_p4, %p1248_p0 }
 0x241   : > { %p1246_p12 = pneg %p1245_p9 }
 0x242   : > { %p1252_p10 = por %p1251_p1, %p1250_p13 }
 0x244   : > { %p1253_p11 = pnand %p1252_p10, %p1246_p12 }
 0x246   : > { %1256 = shalt.err (!%p1253_p11)
}
 0x247   : > { %s1324_s25 = smov 128   ;;  %s1325_s11 = smov 8  }
 0x248   : > { %1062 = dma.vmem_to_hbm [thread:$0]  (%p1604_p8), %s1529_s29, 256, %s1534_s17, %s1536_s16, %s1324_s25, %s1324_s25, %s1325_s11  }
 0x249 PF: > { %p1079_p2 = scmp.ge.s32.totalorder %s1315_s26, 2  ;;  %s823_s12 = sand.u32 1, %s1295_s21  }
 0x24a   : > { %p1605_p3 = scmp.ne.s32.totalorder %s1598_s9, 0  ;;  %s824_s15 = scalar_lea.sflag [#allocation4], %s823_s12 }
 0x24c   : > { %p1072_p5 = pnand %p1079_p2, %p1605_p3 }
 0x24e   : > { %1290 = dma.done.wait (!%p1072_p5), %s824_s15, 256  }
 0x24f   : > { %1292 = vsyncadd (!%p1072_p5), %s824_s15, 4294967040  ;;  %s21_s26 = sadd.s32 1, %s1315_s26   ;;  %s1606_s24 = sld [smem:[#allocation11_spill]] }
 0x250   : > { %p18_p6 = scmp.ge.s32.totalorder %s21_s26, 4   ;;  %s1607_s25 = sld [smem:[#allocation12_spill]] }
 0x251   : > { %s1608_s21 = smov %s1299_s22  ;;  %s1609_s22 = smov %s1303_s23 }
 0x252   : > { %s1610_s23 = smov %s1414_s10  ;;  %20 = sbr.rel (!%p18_p6) target bundleno = 6 (0x6), region = 91 }
 0x259   :  { %829 = vsyncpa [#allocation3], 1 }
 0x25a   :  { %831 = vsyncpa [#allocation3 + $0x1], 1 }
 0x25b   :  { %832 = vsyncpa [#allocation6], 1 }
 0x25c   :  { %833 = vsyncpa [#allocation4], 1 }
 0x25d   :  { %835 = vsyncpa [#allocation4 + $0x1], 1 }

// kernel: tpu_custom_call.1
= control target key start
LH: loop header
LB: loop body
LE: loop exit
PB: predicated region body
PF: predicated region fallthrough
CT: control target
= control target key end

     0   :  { %11 = vsyncpa [#allocation3], 0  ;;  %s1582_s0 = inlined_call_operand.vmem [shape: bf16[2,18,128], index: 0, kind: input, shape index: {}]   ;;  %s1583_s1 = inlined_call_operand.vmem [shape: bf16[2,1,2,128], index: 1, kind: input, shape index: {}]   ;;  %s1584_s2 = inlined_call_operand.hbm [shape: bf16[1,384,128], index: 2, kind: input, shape index: {}]   ;;  %s1585_s3 = inlined_call_operand.vmem [shape: f32[1,1,128], index: 3, kind: input, shape index: {}]   ;;  %s1586_s4 = inlined_call_operand.hbm [shape: bf16[1,128,128], index: 4, kind: input, shape index: {}]   ;;  %s1587_s5 = inlined_call_operand.vmem [shape: f32[1,128], index: 5, kind: input, shape index: {}]   ;;  %s1588_s6 = inlined_call_operand.hbm [shape: f32[2,16,128], index: 6, kind: output, shape index: {}]  }
   0x1   :  { %12 = vsyncpa [#allocation6], 0 }
   0x2   :  { %13 = vsyncpa [#allocation4], 0 }
   0x3   :  { %15 = vsyncpa [#allocation4 + $0x1], 0  ;;  %s1361_s21 = smov 0   ;;  %s1363_s22 = smov 0  }
   0x4   :  { %s1365_s23 = smov 0   ;;  %s1367_s24 = smov 0  }
   0x5   :  { %s1369_s25 = smov 0   ;;  %s1371_s26 = smov 0  }
   0x6 LB: > { %1595 = sst [smem:[#allocation11_spill]] %s1311_s25  ;;  %s921_s27 = sadd.s32 4294967295, %s1315_s26   ;;  %s1315_s26 = sphi %s1371_s26, %s21_s26   ;;  %s1311_s25 = sphi %s1369_s25, %s1607_s25   ;;  %s1307_s24 = sphi %s1367_s24, %s1606_s24   ;;  %s1303_s23 = sphi %s1365_s23, %s1610_s23   ;;  %s1299_s22 = sphi %s1363_s22, %s1609_s22   ;;  %s1295_s21 = sphi %s1361_s21, %s1608_s21  }
   0x7   : > { %s922_s28 = sadd.s32 4294967294, %s1315_s26   ;;  %s33_s29 = sadd.s32 1, %s1311_s25 }
   0x8   : > { %s182_s30 = sadd.s32 1, %s1303_s23  ;;  %p35_p0 = scmp.ge.s32.totalorder %s33_s29, 2 }
   0x9   : > { %p192_p1 = scmp.ne.s32.totalorder %s1303_s23, %s1299_s22  ;;  %p193_p2 = scmp.eq.s32.totalorder %s921_s27, 1 }
   0xa   : > { %p198_p3 = scmp.ne.s32.totalorder %s1299_s22, %s1295_s21  ;;  %s1612_s29 = smov (%p35_p0, %s33_s29), 0 }
   0xb   : > { %1596 = sst [smem:[#allocation12_spill]] %s1612_s29  ;;  %p1401_p4 = por %p193_p2, %p192_p1 }
   0xc   : > { %p199_p5 = scmp.eq.s32.totalorder %s922_s28, 1  ;;  %s177_s8 = ssub.s32 %s1311_s25, %s1612_s29 }
   0xd   : > { %s1597_s7 = scalar_select %p1401_p4, 1, 0 }
   0xe   : > { %p923_p6 = scmp.ge.s32.totalorder %s1315_s26, 1  ;;  %p180_p7 = scmp.eq.s32.totalorder %s177_s8, 0 }
   0xf   : > { %p1408_p8 = por %p199_p5, %p198_p3  ;;  %p206_p9 = scmp.lt.s32.totalorder %s1315_s26, 3 }
  0x10   : > { %s1414_s10 = scalar_select %p180_p7, %s1303_s23, %s182_s30  }
  0x11   : > { %s1598_s9 = scalar_select %p1408_p8, 1, 0 }
  0x12   : > { %p1416_p10 = pnand %p923_p6, %p206_p9  ;;  %p1420_p11 = scmp.eq.s32.totalorder %s921_s27, 0 }
  0x13   : > { %s1317_s13 = smov [#allocation2]   ;;  %s1318_s16 = smov [#allocation5]  }
  0x14   : > { %s1599_s11 = scalar_select %p1416_p10, 1, 0 }
  0x15   : > { %s1600_s12 = scalar_select %p1420_p11, 1, 0 }
  0x16   : > { %p1064_p12 = pneg %p1416_p10  ;;  %s218_s14 = sshll.u32 %s1317_s13, 4  ;;  %s219_s14 = int_to_ptr.vmem [resolvable:$true] %s218_s14 }
  0x17   : > { %s234_s17 = sshll.u32 %s1318_s16, 4  ;;  %s1173_s20 = scalar_lea.hbm %s1584_s2, 3072  ;;  %s1432_s17 = int_to_ptr.vmem [resolvable:$true] %s234_s17 }
  0x18   : > { %p1428_p13 = pnand %p1420_p11, %p1064_p12  ;;  %p1174_p0 = scmp.ne.s32.totalorder %s1584_s2, %s1173_s20 }
  0x19   : > { %p1180_p5 = scmp.lt.u32.totalorder %s1173_s20, %s1584_s2 }
  0x1a   : > { %p1175_p1 = pneg %p1428_p13 }
  0x1c   : > { %p1176_p2 = pnand %p1175_p1, %p1174_p0 }
  0x1e   : > { %p1177_p3 = pneg %p1176_p2 }
  0x20   : > { %p1182_p6 = pnand %p1180_p5, %p1177_p3 }
  0x22   : > { %1185 = shalt.err (!%p1182_p6)
}
  0x23   : > { %s1186_s13 = scalar_lea.vmem %s219_s14, 3072  ;;  %p1194_p8 = scmp.lt.s32.totalorder %s219_s14, %s219_s14 }
  0x24   : > { %p1187_p7 = scmp.ne.s32.totalorder %s219_s14, %s1186_s13  ;;  %p1195_p4 = scmp.lt.s32.totalorder %s1186_s13, %s1186_s13 }
  0x26   : > { %p1189_p9 = pnand %p1187_p7, %p1175_p1  ;;  %p1196_p11 = por %p1195_p4, %p1194_p8 }
  0x28   : > { %p1190_p12 = pneg %p1189_p9 }
  0x2a   : > { %p1197_p10 = pnand %p1196_p11, %p1190_p12 }
  0x2c   : > { %1200 = shalt.err (!%p1197_p10)
}
  0x2d   : > { %s1319_s16 = smov 64   ;;  %s1320_s18 = smov 4  }
  0x2e   : > { %1067 = dma.hbm_to_vmem [thread:$0]  (!%p1428_p13), %s1584_s2, 3072, %s219_s14, [#allocation3], %s1319_s16, %s1319_s16, %s1320_s18  }
  0x2f   : > { %s1201_s30 = scalar_lea.hbm %s1586_s4, 1024 }
  0x30   : > { %p1202_p0 = scmp.ne.s32.totalorder %s1586_s4, %s1201_s30  ;;  %p1208_p10 = scmp.lt.u32.totalorder %s1201_s30, %s1586_s4 }
  0x32   : > { %p1204_p4 = pnand %p1202_p0, %p1175_p1 }
  0x34   : > { %p1205_p8 = pneg %p1204_p4 }
  0x36   : > { %p1210_p11 = pnand %p1208_p10, %p1205_p8 }
  0x38   : > { %1213 = shalt.err (!%p1210_p11)
}
  0x39   : > { %s1214_s14 = scalar_lea.vmem %s1432_s17, 1024  ;;  %p1222_p6 = scmp.lt.s32.totalorder %s1432_s17, %s1432_s17 }
  0x3a   : > { %p1215_p2 = scmp.ne.s32.totalorder %s1432_s17, %s1214_s14  ;;  %p1223_p7 = scmp.lt.s32.totalorder %s1214_s14, %s1214_s14 }
  0x3c   : > { %p1217_p3 = pnand %p1215_p2, %p1175_p1  ;;  %p1224_p9 = por %p1223_p7, %p1222_p6 }
  0x3e   : > { %p1218_p5 = pneg %p1217_p3 }
  0x40   : > { %p1225_p12 = pnand %p1224_p9, %p1218_p5 }
  0x42   : > { %1228 = shalt.err (!%p1225_p12)
}
  0x43   : > { %1070 = dma.hbm_to_vmem [thread:$0]  (!%p1428_p13), %s1586_s4, 1024, %s1432_s17, [#allocation6], %s1319_s16, %s1319_s16, %s1320_s18  }
  0x44   : > { %p1602_p0 = scmp.ne.s32.totalorder %s1599_s11, 0 }
  0x45   : > { %p1603_p4 = scmp.ne.s32.totalorder (!%p1602_p0), %s1600_s12, 0 }
  0x46   : > { %283 = sbr.rel (%p1602_p0) target bundleno = 585 (0x249), region = 44 }
  0x4d   : > { %1282 = dma.done.wait (%p1603_p4), [#allocation3], 3072  }
  0x4e   : > { %1284 = vsyncadd (%p1603_p4), [#allocation3], 4294964224 }
  0x4f   : > { %1286 = dma.done.wait (%p1603_p4), [#allocation6], 1024  }
  0x50   : > { %1288 = vsyncadd (%p1603_p4), [#allocation6], 4294966272  ;;  %v1321_v0 = vmov 0.0   ;;  %vm1322_vm0 = vmmov 0   ;;  %v1136_v1 = vld [vmem:[#allocation2 + $0x40] sm:$0xff]   ;;  %v1139_v4 = vld [vmem:[#allocation2 + $0x48] sm:$0xff]  }
  0x51   : > { %1013 = vmatprep.subr.bf16.mxu1 %v1321_v0  ;;  %1029 = vmatprep.mubr.msk.bf16.mxu1 %vm1322_vm0, %v1321_v0  ;;  %v1137_v2 = vld [vmem:[#allocation2] sm:$0xff]   ;;  %v1140_v5 = vld [vmem:[#allocation2 + $0x8] sm:$0xff]   ;;  %v1142_v7 = vld [vmem:[#allocation2 + $0x50] sm:$0xff]   ;;  %p336_p13 = scmp.lt.s32.totalorder %s1307_s24, 1  ;;  %vm366_vm1 = vsmask.f32 7424 }
  0x52   : > { %973 = vmatprep.subr.bf16.mxu0 %v1136_v1  ;;  %v1138_v3 = vld [vmem:[#allocation2 + $0x80] sm:$0xff]   ;;  %v1141_v6 = vld [vmem:[#allocation2 + $0x88] sm:$0xff]   ;;  %v1143_v8 = vld [vmem:[#allocation2 + $0x10] sm:$0xff]   ;;  %vm381_vm2 = vcmask 1046528   ;;  %s328_s30 = sand.u32 1, %s1299_s22   ;;  %p1604_p8 = scmp.ne.s32.totalorder %s1597_s7, 0 }
  0x53   : > { %974 = vmatpush3.bf16.msra.mxu0 %v1137_v2  ;;  %1014 = vmatpush3.bf16.msra.mxu1 %v1138_v3  ;;  %v1144_v9 = vld [vmem:[#allocation2 + $0x90] sm:$0xff]   ;;  %v1145_v10 = vld [vmem:[#allocation2 + $0x58] sm:$0xff]   ;;  %v1148_v13 = vld [vmem:[#allocation2 + $0x60] sm:$0xff]   ;;  %s337_s11 = scalar_select %p336_p13, %s1307_s24, 1 }
  0x54   : > { %975 = vmatprep.subr.bf16.mxu0 %v1139_v4  ;;  %1015 = vmatprep.subr.bf16.mxu1 %v1321_v0  ;;  %v1146_v11 = vld [vmem:[#allocation2 + $0x18] sm:$0xff]   ;;  %v1149_v14 = vld [vmem:[#allocation2 + $0x20] sm:$0xff]   ;;  %v1151_v16 = vld [vmem:[#allocation2 + $0x68] sm:$0xff]   ;;  %s930_s8 = sshll.u32 %s328_s30, 4  ;;  %s1323_s18 = smov [#allocation7]  }
  0x55   : > { %v1147_v12 = vld [vmem:[#allocation2 + $0x98] sm:$0xff]   ;;  %v1150_v15 = vld [vmem:[#allocation2 + $0xa0] sm:$0xff]   ;;  %s1053_s12 = smul.u32 12, %s337_s11  ;;  %v1152_v17 = vld [vmem:[#allocation2 + $0x28] sm:$0xff]   ;;  %s354_s16 = scalar_lea.vmem %s1583_s1, %s337_s11 }
  0x56   : > { %v1153_v18 = vld [vmem:[#allocation2 + $0xa8] sm:$0xff]   ;;  %v1154_v19 = vld [vmem:[#allocation2 + $0x70] sm:$0xff]   ;;  %v1157_v22 = vld [vmem:[#allocation2 + $0x78] sm:$0xff]   ;;  %s330_s25 = scalar_lea.vmem [#allocation7], %s930_s8  ;;  %s972_s11 = sshll.u32 %s1307_s24, 8 }
  0x57   : > { %976 = vmatpush3.bf16.msra.mxu0 %v1140_v5  ;;  %1016 = vmatpush3.bf16.msra.mxu1 %v1141_v6  ;;  %v1155_v20 = vld [vmem:[#allocation2 + $0x30] sm:$0xff]   ;;  %s343_s20 = scalar_lea.vmem %s1582_s0, %s1053_s12  ;;  %v359_v23 = vld [vmem:[%s354_s16] sm:$0x1]  ;;  %v1158_v26 = vld [vmem:[#allocation2 + $0x38] sm:$0xff]   ;;  %s808_s29 = sshll.u32 %s330_s25, 4  ;;  %s1529_s29 = int_to_ptr.vmem [resolvable:$true] %s808_s29 }
  0x58   : > { %977 = vmatprep.subr.bf16.mxu0 %v1142_v7  ;;  %1017 = vmatprep.subr.bf16.mxu1 %v1321_v0  ;;  %v1156_v21 = vld [vmem:[#allocation2 + $0xb0] sm:$0xff]   ;;  %v1159_v24 = vld [vmem:[%s343_s20] sm:$0xff]   ;;  %v375_v25 = vshll.u32 %v359_v23, 16  ;;  %v1160_v30 = vld [vmem:[#allocation2 + $0xb8] sm:$0xff]   ;;  %v383_v31 = vrot.slane %v359_v23, 1  ;;  %s1534_s17 = scalar_lea.hbm %s1588_s6, %s972_s11  ;;  %s1536_s16 = scalar_lea.sflag [#allocation4], %s328_s30 }
  0x59   : > { %v368_v27 = vshrl.u32 %v1159_v24, 16  ;;  %v370_v28 = vshll.u32 %v1159_v24, 16  ;;  %v382_v33 = vrot.slane %v1159_v24, 1  ;;  %v1161_v34 = vld [vmem:[#allocation5] sm:$0xff]   ;;  %v1162_v38 = vld [vmem:[#allocation5 + $0x8] sm:$0xff]   ;;  %v1163_v39 = vld [vmem:[#allocation5 + $0x10] sm:$0xff]  }
  0x5a   : > { %v377_v29 = vrot.slane %v375_v25, 1  ;;  %v1164_v40 = vld [vmem:[#allocation5 + $0x18] sm:$0xff]   ;;  %v1165_v41 = vld [vmem:[#allocation5 + $0x20] sm:$0xff]   ;;  %v1166_v42 = vld [vmem:[#allocation5 + $0x28] sm:$0xff]   ;;  %s1229_s24 = scalar_lea.vmem %s1529_s29, 256  ;;  %s1233_s19 = sshll.u32 %s1323_s18, 4  ;;  %s1234_s19 = int_to_ptr.vmem [resolvable:$false] %s1233_s19 }
  0x5b   : > { %978 = vmatpush3.bf16.msra.mxu0 %v1143_v8  ;;  %1018 = vmatpush3.bf16.msra.mxu1 %v1144_v9  ;;  %v372_v32 = vrot.slane %v370_v28, 1  ;;  %v384_v37 = vsel %vm381_vm2, %v382_v33, %v383_v31  ;;  %v1167_v43 = vld [vmem:[#allocation5 + $0x30] sm:$0xff]   ;;  %v1168_v44 = vld [vmem:[#allocation5 + $0x38] sm:$0xff]   ;;  %v933_v47 = vld [vmem:[%s1585_s3] ss:$0 sm:$0xff]  ;;  %p1230_p1 = scmp.ne.s32.totalorder %s1529_s29, %s1229_s24  ;;  %s1235_s20 = scalar_lea.vmem %s1234_s19, 512 }
  0x5c   : > { %979 = vmatprep.subr.bf16.mxu0 %v1145_v10  ;;  %1019 = vmatprep.subr.bf16.mxu1 %v1321_v0  ;;  %v958_v7 = vld [vmem:[%s1587_s5] ss:$0 sm:$0xff]  ;;  %p1236_p2 = scmp.lt.s32.totalorder %s1529_s29, %s1234_s19  ;;  %p1237_p3 = scmp.lt.s32.totalorder %s1235_s20, %s1229_s24 }
  0x5d   : > { %v373_v35 = vor.u32 %v372_v32, %v368_v27  ;;  %p1231_p10 = pnand %p1230_p1, %p1604_p8 }
  0x5e   : > { %p1238_p5 = por %p1237_p3, %p1236_p2 }
  0x5f   : > { %980 = vmatpush3.bf16.msra.mxu0 %v1146_v11  ;;  %1020 = vmatpush3.bf16.msra.mxu1 %v1147_v12  ;;  %v378_v36 = vsel %vm366_vm1, %v373_v35, %v377_v29  ;;  %p1232_p11 = pneg %p1231_p10 }
  0x60   : > { %981 = vmatprep.subr.bf16.mxu0 %v1148_v13  ;;  %1021 = vmatprep.subr.bf16.mxu1 %v1321_v0 }
  0x61   : > { %617 = vmatprep.mubr.bf16.mxu0 %v378_v36  ;;  %p1239_p6 = pnand %p1238_p5, %p1232_p11 }
  0x63   : > { %982 = vmatpush3.bf16.msra.mxu0 %v1149_v14  ;;  %1022 = vmatpush3.bf16.msra.mxu1 %v1150_v15 }
  0x64   : > { %983 = vmatprep.subr.bf16.mxu0 %v1151_v16  ;;  %1023 = vmatprep.subr.bf16.mxu1 %v1321_v0 }
  0x67   : > { %984 = vmatpush3.bf16.msra.mxu0 %v1152_v17  ;;  %1024 = vmatpush3.bf16.msra.mxu1 %v1153_v18 }
  0x68   : > { %985 = vmatprep.subr.bf16.mxu0 %v1154_v19  ;;  %1025 = vmatprep.subr.bf16.mxu1 %v1321_v0 }
  0x6b   : > { %986 = vmatpush3.bf16.msra.mxu0 %v1155_v20  ;;  %1026 = vmatpush3.bf16.msra.mxu1 %v1156_v21 }
  0x6c   : > { %987 = vmatprep.subr.bf16.mxu0 %v1157_v22  ;;  %1027 = vmatprep.subr.bf16.mxu1 %v1321_v0 }
  0x6f   : > { %988 = vmatpush3.bf16.msra.mxu0 %v1158_v26  ;;  %1028 = vmatpush3.bf16.msra.mxu1 %v1160_v30 }
  0x70   : > { %1033 = vmatprep.subr.bf16.mxu0 %v1321_v0 }
  0x72   : > { %618 = vmatmul.mubr.bf16.vlgmr.msra.gmra.mrb[0].mxu0 %v1159_v24  ;;  %1030 = vmatmul.mubr.bf16.vlgmr.msra.gmra.mrb[0].mxu1 %v384_v37 }
  0x73   : > { %1034 = vmatpush3.bf16.msra.mxu0 %v1161_v34  ;;  %1049 = vmatprep.mubr.msk.bf16.mxu0 %vm1322_vm0, %v1321_v0 }
  0x74   : > { %1035 = vmatprep.subr.bf16.mxu0 %v1321_v0 }
  0x77   : > { %1036 = vmatpush3.bf16.msra.mxu0 %v1162_v38 }
  0x78   : > { %1037 = vmatprep.subr.bf16.mxu0 %v1321_v0 }
  0x7b   : > { %1038 = vmatpush3.bf16.msra.mxu0 %v1163_v39 }
  0x7c   : > { %1039 = vmatprep.subr.bf16.mxu0 %v1321_v0 }
  0x7f   : > { %1040 = vmatpush3.bf16.msra.mxu0 %v1164_v40 }
  0x80   : > { %1041 = vmatprep.subr.bf16.mxu0 %v1321_v0 }
  0x83   : > { %1042 = vmatpush3.bf16.msra.mxu0 %v1165_v41 }
  0x84   : > { %1043 = vmatprep.subr.bf16.mxu0 %v1321_v0 }
  0x87   : > { %1044 = vmatpush3.bf16.msra.mxu0 %v1166_v42 }
  0x88   : > { %1045 = vmatprep.subr.bf16.mxu0 %v1321_v0 }
  0x8b   : > { %1046 = vmatpush3.bf16.msra.mxu0 %v1167_v43 }
  0x8c   : > { %1047 = vmatprep.subr.bf16.mxu0 %v1321_v0 }
  0x8f   : > { %1048 = vmatpush3.bf16.msra.mxu0 %v1168_v44 }
 0x145   : > { %v989_v45 = vpop.f32.mrb[0].mxu0  ;;  %v660_v48 = vpop.f32.mrb[0].mxu1 }
 0x146   : > { %v990_v46 = vpop.f32.mrb[1].mxu0  ;;  %v1031_v51 = vpop.f32.mrb[1].mxu1 }
 0x147   : > { %v991_v49 = vadd.f32 %v990_v46, %v989_v45  ;;  %v992_v50 = vpop.f32.mrb[2].mxu0  ;;  %v663_v53 = vpop.f32.mrb[2].mxu1 }
 0x148   : > { %v993_v52 = vpop.f32.mrb[3].mxu0  ;;  %v1032_v56 = vpop.f32.mrb[3].mxu1 }
 0x149   : > { %v620_v54 = vadd.f32 %v991_v49, %v933_v47  ;;  %v994_v55 = vadd.f32 %v993_v52, %v992_v50 }
 0x14b   : > { %v661_v57 = vadd.f32 %v660_v48, %v620_v54  ;;  %v623_v58 = vadd.f32 %v994_v55, %v933_v47 }
 0x14d   : > { %v669_v59 = vmul.f32 0.70710677, %v661_v57  ;;  %v664_v60 = vadd.f32 %v663_v53, %v623_v58  ;;  %v667_v1 = vmul.f32 0.5, %v661_v57 }
 0x14f   : > { %1169 = verf.f32 %v669_v59  ;;  %v670_v61 = vmul.f32 0.70710677, %v664_v60  ;;  %v668_v2 = vmul.f32 0.5, %v664_v60 }
 0x151   : > { %1171 = verf.f32 %v670_v61 }
 0x159   : > { %v1170_v62 = vpop.eup %1169 }
 0x15a   : > { %v673_v63 = vadd.f32 1.0, %v1170_v62 }
 0x15b   : > { %v1172_v0 = vpop.eup %1171 }
 0x15c   : > { %v674_v3 = vadd.f32 1.0, %v1172_v0  ;;  %v675_v4 = vmul.f32 %v673_v63, %v667_v1 }
 0x15e   : > { %v676_v5 = vmul.f32 %v674_v3, %v668_v2 }
 0x160   : > { %v677_v6 = vpack.c.bf16 %v676_v5, %v675_v4 }
 0x162   : > { %1050 = vmatmul.mubr.bf16.vlgmr.msra.gmra.mrb[4].mxu0 %v677_v6 }
 0x235   : > { %v783_v8 = vpop.f32.mrb[4].mxu0 }
 0x236   : > { %v784_v9 = vadd.f32 %v958_v7, %v783_v8  ;;  %v1051_v10 = vpop.f32.mrb[5].mxu0 }
 0x237   : > { %v786_v11 = vpop.f32.mrb[6].mxu0 }
 0x238   : > { %790 = vst [vmem:[%s330_s25] sm:$0xff] %v784_v9  ;;  %v787_v12 = vadd.f32 %v958_v7, %v786_v11  ;;  %v1052_v13 = vpop.f32.mrb[7].mxu0 }
 0x23a   : > { %791 = vst [vmem:[%s330_s25 + $0x8] sm:$0xff] %v787_v12 }
 0x23b   : > { %1242 = shalt.err (!%p1239_p6)
}
 0x23c   : > { %s1243_s27 = scalar_lea.hbm %s1534_s17, 256  ;;  %s1247_s8 = scalar_lea.hbm %s1588_s6, 512 }
 0x23d   : > { %p1244_p7 = scmp.ne.s32.totalorder %s1534_s17, %s1243_s27  ;;  %p1248_p0 = scmp.lt.u32.totalorder %s1534_s17, %s1588_s6 }
 0x23e   : > { %p1249_p4 = scmp.lt.u32.totalorder %s1247_s8, %s1243_s27  ;;  %p1251_p1 = scmp.lt.u32.totalorder %s1243_s27, %s1534_s17 }
 0x23f   : > { %p1245_p9 = pnand %p1244_p7, %p1604_p8 }
 0x240   : > { %p1250_p13 = por %p1249_p4, %p1248_p0 }
 0x241   : > { %p1246_p12 = pneg %p1245_p9 }
 0x242   : > { %p1252_p10 = por %p1251_p1, %p1250_p13 }
 0x244   : > { %p1253_p11 = pnand %p1252_p10, %p1246_p12 }
 0x246   : > { %1256 = shalt.err (!%p1253_p11)
}
 0x247   : > { %s1324_s25 = smov 128   ;;  %s1325_s11 = smov 8  }
 0x248   : > { %1062 = dma.vmem_to_hbm [thread:$0]  (%p1604_p8), %s1529_s29, 256, %s1534_s17, %s1536_s16, %s1324_s25, %s1324_s25, %s1325_s11  }
 0x249 PF: > { %p1079_p2 = scmp.ge.s32.totalorder %s1315_s26, 2  ;;  %s823_s12 = sand.u32 1, %s1295_s21  }
 0x24a   : > { %p1605_p3 = scmp.ne.s32.totalorder %s1598_s9, 0  ;;  %s824_s15 = scalar_lea.sflag [#allocation4], %s823_s12 }
 0x24c   : > { %p1072_p5 = pnand %p1079_p2, %p1605_p3 }
 0x24e   : > { %1290 = dma.done.wait (!%p1072_p5), %s824_s15, 256  }
 0x24f   : > { %1292 = vsyncadd (!%p1072_p5), %s824_s15, 4294967040  ;;  %s21_s26 = sadd.s32 1, %s1315_s26   ;;  %s1606_s24 = sld [smem:[#allocation11_spill]] }
 0x250   : > { %p18_p6 = scmp.ge.s32.totalorder %s21_s26, 4   ;;  %s1607_s25 = sld [smem:[#allocation12_spill]] }
 0x251   : > { %s1608_s21 = smov %s1299_s22  ;;  %s1609_s22 = smov %s1303_s23 }
 0x252   : > { %s1610_s23 = smov %s1414_s10  ;;  %20 = sbr.rel (!%p18_p6) target bundleno = 6 (0x6), region = 91 }
 0x259   :  { %829 = vsyncpa [#allocation3], 1 }
 0x25a   :  { %831 = vsyncpa [#allocation3 + $0x1], 1 }
 0x25b   :  { %832 = vsyncpa [#allocation6], 1 }
 0x25c   :  { %833 = vsyncpa [#allocation4], 1 }
 0x25d   :  { %835 = vsyncpa [#allocation4 + $0x1], 1 }

</bundles_post_ra>
